<compile_context>
chip_gen: v7x
topology: tpu7x:2x2x1
jax: 0.10.0
libtpu: 0.0.40
codegen_flags: <defaults>
</compile_context>

<pallas_src>
import functools

import jax
import jax.numpy as jnp
from jax.experimental import pallas as pl
from jax.experimental.pallas import tpu as pltpu

LANES = 128            # vreg lane width; feature output dims padded to this.
SUBLANE_PACK = 16      # bf16 sublane-pair packing; batch tiles stay multiples of 16.
VMEM_BUDGET = 48 * 1024 * 1024        # conservative vs v7x's 64 MiB/TC VMEM.
DEFAULT_SCOPED_VMEM = 32 * 1024 * 1024


def _round_up(n, m):
    return ((n + m - 1) // m) * m


# ---------------------------------------------------------------------------
# Kernel
# ---------------------------------------------------------------------------
def decoder_kernel(z_ref, w1_ref, b1_ref, w2_ref, b2_ref, w3_ref, b3_ref, out_ref):
    """Fused 3-layer MLP: (Linear+ReLU) x2 -> Linear -> Sigmoid.

    z arrives as f32 with the real (unpadded) K = n_z; it is cast to bf16 here
    so the MXU operand is native without an extra XLA pass over z in HBM.
    Weights are bf16, biases f32, matmuls accumulate in f32.
    """
    z = z_ref[...].astype(jnp.bfloat16)
    # Layer 1: Linear + ReLU
    h = jnp.dot(z, w1_ref[...], preferred_element_type=jnp.float32)
    h = jnp.maximum(h + b1_ref[...], 0.0)
    # Layer 2: Linear + ReLU
    h = jnp.dot(h.astype(jnp.bfloat16), w2_ref[...],
                preferred_element_type=jnp.float32)
    h = jnp.maximum(h + b2_ref[...], 0.0)
    # Layer 3: Linear + Sigmoid
    logits = jnp.dot(h.astype(jnp.bfloat16), w3_ref[...],
                     preferred_element_type=jnp.float32)
    logits = logits + b3_ref[...]
    out_ref[...] = jax.nn.sigmoid(logits).astype(out_ref.dtype)


# ---------------------------------------------------------------------------
# Parameter packing
# ---------------------------------------------------------------------------
def pack_decoder_params(params):
    """Pad feature OUTPUT dims (and matching weight input dims) to multiples of
    128; weights -> bf16, biases -> f32. W1's input dim (n_z) is left unpadded
    — the kernel consumes raw-K z directly."""
    w1, b1, w2, b2, w3, b3 = params

    def pad_w(w, pad_in):
        fi, fo = w.shape
        fi_p = _round_up(fi, LANES) if pad_in else fi
        fo_p = _round_up(fo, LANES)
        return jnp.pad(w, ((0, fi_p - fi), (0, fo_p - fo))).astype(jnp.bfloat16)

    def pad_b(b):
        fo = b.shape[-1]
        return jnp.pad(b.reshape(1, fo).astype(jnp.float32),
                       ((0, 0), (0, _round_up(fo, LANES) - fo)))

    return (pad_w(w1, False), pad_b(b1),
            pad_w(w2, True), pad_b(b2),
            pad_w(w3, True), pad_b(b3))


# ---------------------------------------------------------------------------
# Tile / VMEM sizing
# ---------------------------------------------------------------------------
def _vmem_bytes(tb, n_z, h1_p, h2_p, n_out_p, out_itemsize):
    """Conservative VMEM estimate for one grid step (double-buffered I/O)."""
    weights = 2 * 2 * (n_z * h1_p + h1_p * h2_p + h2_p * n_out_p)   # bf16, x2 bufs
    biases = 2 * 4 * (h1_p + h2_p + n_out_p)
    z_buf = 2 * tb * n_z * 4                                        # f32 input tile
    out_buf = 2 * tb * n_out_p * out_itemsize
    acts = tb * (h1_p + h2_p) * 4                                   # f32 intermediates
    return weights + biases + z_buf + out_buf + acts


def _pick_batch_tile(B, n_z, h1_p, h2_p, n_out_p, out_itemsize):
    if B < 256:
        # Single grid step; 16-row alignment keeps bf16 sublane packing unmasked.
        return _round_up(B, SUBLANE_PACK)
    # >= 2 grid steps so v7x's two TensorCores both take work; larger batches
    # get bigger tiles (512/1024) to amortize ~0.35 us/step overhead.
    if B < 1024:
        tb = 256
    elif B < 4096:
        tb = 512
    else:
        tb = 1024
    while tb > 256 and _vmem_bytes(tb, n_z, h1_p, h2_p, n_out_p,
                                   out_itemsize) > VMEM_BUDGET:
        tb //= 2
    return tb


# ---------------------------------------------------------------------------
# Wrapper
# ---------------------------------------------------------------------------
@functools.partial(jax.jit,
                   static_argnames=("n_input", "out_dtype", "tb", "trim"))
def decoder_forward(z, packed_params, n_input, *, out_dtype=jnp.float32,
                    tb=None, trim=True):
    """Run the fused decoder MLP.

    z: (B, n_z) float32.
    Returns (B, n_input) in `out_dtype` when trim=True, else the padded
    lane-dense (B_p, n_out_p) slab (padded cols hold sigmoid(0) = 0.5).
    Pass out_dtype=jnp.bfloat16 to halve HBM output-write traffic.
    """
    w1, b1, w2, b2, w3, b3 = packed_params
    B, n_z = z.shape
    n_z_w, h1_p = w1.shape
    assert n_z_w == n_z, "packed W1 input dim must equal n_z (unpadded K)"
    _, h2_p = w2.shape
    _, n_out_p = w3.shape

    out_itemsize = jnp.dtype(out_dtype).itemsize
    if tb is None:
        tb = _pick_batch_tile(B, n_z, h1_p, h2_p, n_out_p, out_itemsize)
    B_p = _round_up(B, tb)
    z_p = jnp.pad(z, ((0, B_p - B), (0, 0))) if B_p != B else z

    # Raise the scoped-VMEM limit only when the estimated footprint needs it
    # (capped at v7x's 64 MiB/TC physical VMEM).
    vmem_need = _vmem_bytes(tb, n_z, h1_p, h2_p, n_out_p, out_itemsize)
    vmem_limit = None
    if vmem_need > (DEFAULT_SCOPED_VMEM * 3) // 4:
        vmem_limit = min(_round_up(vmem_need * 5 // 4, 1 << 20), 64 * 1024 * 1024)

    const = lambda i: (0, 0)  # weights/biases: same block every grid step
    # TODO(synk): when hidden dims scale well beyond 128, single-buffer the
    # constant-index weight/bias specs (pipeline_mode=pl.Buffered(1)) to halve
    # their resident VMEM footprint on v7x.
    out_p = pl.pallas_call(
        decoder_kernel,
        out_shape=jax.ShapeDtypeStruct((B_p, n_out_p), out_dtype),
        grid_spec=pl.GridSpec(
            grid=(B_p // tb,),
            in_specs=[
                pl.BlockSpec((tb, n_z), lambda i: (i, 0)),   # z tile (f32, raw K)
                pl.BlockSpec((n_z, h1_p), const),            # W1 (full)
                pl.BlockSpec((1, h1_p), const),              # b1
                pl.BlockSpec((h1_p, h2_p), const),            # W2 (full)
                pl.BlockSpec((1, h2_p), const),               # b2
                pl.BlockSpec((h2_p, n_out_p), const),         # W3 (full)
                pl.BlockSpec((1, n_out_p), const),            # b3
            ],
            out_specs=pl.BlockSpec((tb, n_out_p), lambda i: (i, 0)),
        ),
        compiler_params=pltpu.CompilerParams(
            dimension_semantics=("parallel",),
            vmem_limit_bytes=vmem_limit,
        ),
    )(z_p, w1, b1, w2, b2, w3, b3)

    if not trim:
        return out_p  # padded lane-dense slab; consumer must mask/slice.
    if B_p != B or n_out_p != n_input:
        out_p = out_p[:B, :n_input]
    return out_p


# ---------------------------------------------------------------------------
# Init (matches PyTorch weights_init) + reference
# ---------------------------------------------------------------------------
def xavier_uniform(key, fan_in, fan_out, gain=0.5, dtype=jnp.float32):
    """nn.init.xavier_uniform_(gain=0.5): U(-a, a), a = gain*sqrt(6/(fi+fo))."""
    a = gain * jnp.sqrt(6.0 / (fan_in + fan_out))
    return jax.random.uniform(key, (fan_in, fan_out), dtype, minval=-a, maxval=a)


def init_decoder_params(key, net_arch):
    n_z = net_arch["n_z"]
    h1 = net_arch["n_hidden_decoder1"]
    h2 = net_arch["n_hidden_decoder2"]
    n_in = net_arch["n_input"]
    k1, k2, k3 = jax.random.split(key, 3)
    # Stored as (in, out): y = x @ W + b  ==  PyTorch x @ W.T with (out, in) W.
    return (
        xavier_uniform(k1, n_z, h1), jnp.zeros((1, h1), jnp.float32),
        xavier_uniform(k2, h1, h2), jnp.zeros((1, h2), jnp.float32),
        xavier_uniform(k3, h2, n_in), jnp.zeros((1, n_in), jnp.float32),
    )


def decoder_ref(z, params):
    """Pure-JAX reference with the same precision policy as the kernel
    (bf16 matmul operands, f32 accumulation / bias / activations)."""
    w1, b1, w2, b2, w3, b3 = params

    def lin(x, w, b):
        return jnp.dot(x.astype(jnp.bfloat16), w.astype(jnp.bfloat16),
                       preferred_element_type=jnp.float32) + b

    h = jnp.maximum(lin(z, w1, b1), 0.0)
    h = jnp.maximum(lin(h, w2, b2), 0.0)
    return jax.nn.sigmoid(lin(h, w3, b3))


if __name__ == "__main__":
    net_arch = {
        "n_z": 32,
        "n_hidden_decoder1": 64,
        "n_hidden_decoder2": 64,
        "n_input": 128,
    }
    key = jax.random.PRNGKey(0)
    kz, kz2, kp = jax.random.split(key, 3)
    params = init_decoder_params(kp, net_arch)
    packed = pack_decoder_params(params)

    # --- small batch (single grid step, row padding to 16) ---
    B = 8
    z = jax.random.normal(kz, (B, net_arch["n_z"]), dtype=jnp.float32)
    out = jax.block_until_ready(decoder_forward(z, packed, net_arch["n_input"]))
    ref = decoder_ref(z, params)
    assert out.shape == (B, net_arch["n_input"]) and out.dtype == jnp.float32
    assert jnp.allclose(out, ref, atol=2e-4, rtol=2e-4), (
        float(jnp.max(jnp.abs(out - ref))))

    # --- bf16 output path (halves HBM write traffic at large B) ---
    out_bf16 = jax.block_until_ready(
        decoder_forward(z, packed, net_arch["n_input"], out_dtype=jnp.bfloat16))
    assert out_bf16.dtype == jnp.bfloat16
    assert jnp.allclose(out_bf16.astype(jnp.float32), ref, atol=8e-3, rtol=8e-3)

    # --- mid batch: exercises the >=2 grid-step (multi-TensorCore) path ---
    B2 = 384
    z2 = jax.random.normal(kz2, (B2, net_arch["n_z"]), dtype=jnp.float32)
    out2 = jax.block_until_ready(decoder_forward(z2, packed, net_arch["n_input"]))
    ref2 = decoder_ref(z2, params)
    assert out2.shape == (B2, net_arch["n_input"])
    assert jnp.allclose(out2, ref2, atol=2e-4, rtol=2e-4), (
        float(jnp.max(jnp.abs(out2 - ref2))))

    print("KERNEL_OK")
</pallas_src>

<mosaic_0001>
module attributes {stable_mosaic.version = 11 : i64} {
  func.func @decoder_kernel(%arg0: i32, %arg1: memref<16x32xf32, #tpu.memory_space<vmem>>, %arg2: memref<32x128xbf16, #tpu.memory_space<vmem>>, %arg3: memref<1x128xf32, #tpu.memory_space<vmem>>, %arg4: memref<128x128xbf16, #tpu.memory_space<vmem>>, %arg5: memref<1x128xf32, #tpu.memory_space<vmem>>, %arg6: memref<128x128xbf16, #tpu.memory_space<vmem>>, %arg7: memref<1x128xf32, #tpu.memory_space<vmem>>, %arg8: memref<16x128xf32, #tpu.memory_space<vmem>>) attributes {dimension_semantics = [#tpu.dimension_semantics<parallel>], iteration_bounds = array<i64: 1>, scalar_prefetch = 0 : i64, scratch_operands = 0 : i64, tpu.core_type = #tpu.core_type<tc>, window_params = [{transform_indices = @transform_0, window_bounds = array<i64: 16, 32>}, {pipeline_mode = #tpu.pipeline_mode<synchronous>, transform_indices = @transform_1, window_bounds = array<i64: 32, 128>}, {pipeline_mode = #tpu.pipeline_mode<synchronous>, transform_indices = @transform_2, window_bounds = array<i64: 1, 128>}, {pipeline_mode = #tpu.pipeline_mode<synchronous>, transform_indices = @transform_3, window_bounds = array<i64: 128, 128>}, {pipeline_mode = #tpu.pipeline_mode<synchronous>, transform_indices = @transform_4, window_bounds = array<i64: 1, 128>}, {pipeline_mode = #tpu.pipeline_mode<synchronous>, transform_indices = @transform_5, window_bounds = array<i64: 128, 128>}, {pipeline_mode = #tpu.pipeline_mode<synchronous>, transform_indices = @transform_6, window_bounds = array<i64: 1, 128>}, {transform_indices = @transform_7, window_bounds = array<i64: 16, 128>}]} {
    %c0 = arith.constant 0 : index
    %c0_0 = arith.constant 0 : index
    %0 = vector.load %arg1[%c0, %c0_0] : memref<16x32xf32, #tpu.memory_space<vmem>>, vector<16x32xf32>
    %1 = arith.truncf %0 : vector<16x32xf32> to vector<16x32xbf16>
    %c0_1 = arith.constant 0 : index
    %c0_2 = arith.constant 0 : index
    %2 = vector.load %arg2[%c0_1, %c0_2] : memref<32x128xbf16, #tpu.memory_space<vmem>>, vector<32x128xbf16>
    %cst = arith.constant dense<0.000000e+00> : vector<16x128xf32>
    %3 = tpu.matmul %1, %2, %cst {dimension_numbers = #tpu.dot_dimension_numbers<[1], [0], [0], [1], [0, 0, 1, 1], [], []>} : vector<16x32xbf16>, vector<32x128xbf16>, vector<16x128xf32> -> vector<16x128xf32>
    %c0_3 = arith.constant 0 : index
    %c0_4 = arith.constant 0 : index
    %4 = vector.load %arg3[%c0_3, %c0_4] : memref<1x128xf32, #tpu.memory_space<vmem>>, vector<1x128xf32>
    %5 = vector.broadcast %4 : vector<1x128xf32> to vector<16x128xf32>
    %6 = arith.addf %3, %5 : vector<16x128xf32>
    %cst_5 = arith.constant 0.000000e+00 : f32
    %7 = vector.broadcast %cst_5 : f32 to vector<16x128xf32>
    %8 = arith.maximumf %6, %7 : vector<16x128xf32>
    %9 = arith.truncf %8 : vector<16x128xf32> to vector<16x128xbf16>
    %c0_6 = arith.constant 0 : index
    %c0_7 = arith.constant 0 : index
    %10 = vector.load %arg4[%c0_6, %c0_7] : memref<128x128xbf16, #tpu.memory_space<vmem>>, vector<128x128xbf16>
    %cst_8 = arith.constant dense<0.000000e+00> : vector<16x128xf32>
    %11 = tpu.matmul %9, %10, %cst_8 {dimension_numbers = #tpu.dot_dimension_numbers<[1], [0], [0], [1], [0, 0, 1, 1], [], []>} : vector<16x128xbf16>, vector<128x128xbf16>, vector<16x128xf32> -> vector<16x128xf32>
    %c0_9 = arith.constant 0 : index
    %c0_10 = arith.constant 0 : index
    %12 = vector.load %arg5[%c0_9, %c0_10] : memref<1x128xf32, #tpu.memory_space<vmem>>, vector<1x128xf32>
    %13 = vector.broadcast %12 : vector<1x128xf32> to vector<16x128xf32>
    %14 = arith.addf %11, %13 : vector<16x128xf32>
    %cst_11 = arith.constant 0.000000e+00 : f32
    %15 = vector.broadcast %cst_11 : f32 to vector<16x128xf32>
    %16 = arith.maximumf %14, %15 : vector<16x128xf32>
    %17 = arith.truncf %16 : vector<16x128xf32> to vector<16x128xbf16>
    %c0_12 = arith.constant 0 : index
    %c0_13 = arith.constant 0 : index
    %18 = vector.load %arg6[%c0_12, %c0_13] : memref<128x128xbf16, #tpu.memory_space<vmem>>, vector<128x128xbf16>
    %cst_14 = arith.constant dense<0.000000e+00> : vector<16x128xf32>
    %19 = tpu.matmul %17, %18, %cst_14 {dimension_numbers = #tpu.dot_dimension_numbers<[1], [0], [0], [1], [0, 0, 1, 1], [], []>} : vector<16x128xbf16>, vector<128x128xbf16>, vector<16x128xf32> -> vector<16x128xf32>
    %c0_15 = arith.constant 0 : index
    %c0_16 = arith.constant 0 : index
    %20 = vector.load %arg7[%c0_15, %c0_16] : memref<1x128xf32, #tpu.memory_space<vmem>>, vector<1x128xf32>
    %21 = vector.broadcast %20 : vector<1x128xf32> to vector<16x128xf32>
    %22 = arith.addf %19, %21 : vector<16x128xf32>
    %23 = arith.negf %22 : vector<16x128xf32>
    %24 = math.exp %23 : vector<16x128xf32>
    %cst_17 = arith.constant 1.000000e+00 : f32
    %25 = vector.broadcast %cst_17 : f32 to vector<16x128xf32>
    %26 = arith.addf %25, %24 : vector<16x128xf32>
    %27 = arith.divf %25, %26 : vector<16x128xf32>
    %c0_18 = arith.constant 0 : index
    %c0_19 = arith.constant 0 : index
    %28 = vector.load %arg8[%c0_18, %c0_19] : memref<16x128xf32, #tpu.memory_space<vmem>>, vector<16x128xf32>
    tpu.vector_store %arg8[%c0_18, %c0_19], %27 {strides = array<i32>} : memref<16x128xf32, #tpu.memory_space<vmem>>, vector<16x128xf32>,
    return
  }
  func.func @transform_0(%arg0: i32) -> (i32, i32) {
    %c0_i32 = arith.constant 0 : i32
    %c0_i32_0 = arith.constant 0 : i32
    return %arg0, %c0_i32 : i32, i32
  }
  func.func @transform_1(%arg0: i32) -> (i32, i32) {
    %c0_i32 = arith.constant 0 : i32
    %c0_i32_0 = arith.constant 0 : i32
    %c0_i32_1 = arith.constant 0 : i32
    return %c0_i32, %c0_i32_0 : i32, i32
  }
  func.func @transform_2(%arg0: i32) -> (i32, i32) {
    %c0_i32 = arith.constant 0 : i32
    %c0_i32_0 = arith.constant 0 : i32
    %c0_i32_1 = arith.constant 0 : i32
    return %c0_i32, %c0_i32_0 : i32, i32
  }
  func.func @transform_3(%arg0: i32) -> (i32, i32) {
    %c0_i32 = arith.constant 0 : i32
    %c0_i32_0 = arith.constant 0 : i32
    %c0_i32_1 = arith.constant 0 : i32
    return %c0_i32, %c0_i32_0 : i32, i32
  }
  func.func @transform_4(%arg0: i32) -> (i32, i32) {
    %c0_i32 = arith.constant 0 : i32
    %c0_i32_0 = arith.constant 0 : i32
    %c0_i32_1 = arith.constant 0 : i32
    return %c0_i32, %c0_i32_0 : i32, i32
  }
  func.func @transform_5(%arg0: i32) -> (i32, i32) {
    %c0_i32 = arith.constant 0 : i32
    %c0_i32_0 = arith.constant 0 : i32
    %c0_i32_1 = arith.constant 0 : i32
    return %c0_i32, %c0_i32_0 : i32, i32
  }
  func.func @transform_6(%arg0: i32) -> (i32, i32) {
    %c0_i32 = arith.constant 0 : i32
    %c0_i32_0 = arith.constant 0 : i32
    %c0_i32_1 = arith.constant 0 : i32
    return %c0_i32, %c0_i32_0 : i32, i32
  }
  func.func @transform_7(%arg0: i32) -> (i32, i32) {
    %c0_i32 = arith.constant 0 : i32
    %c0_i32_0 = arith.constant 0 : i32
    return %arg0, %c0_i32 : i32, i32
  }
}

</mosaic_0001>

<bundles_post_ra>
// kernel: decoder_forward.1
= control target key start
LH: loop header
LB: loop body
LE: loop exit
PB: predicated region body
PF: predicated region fallthrough
CT: control target
= control target key end

     0   :  { %12 = vsyncpa [#allocation3], 0  ;;  %s670_s0 = inlined_call_operand.vmem [shape: f32[16,32], index: 0, kind: input, shape index: {}]   ;;  %s671_s1 = inlined_call_operand.vmem [shape: bf16[32,128], index: 1, kind: input, shape index: {}]   ;;  %s672_s2 = inlined_call_operand.vmem [shape: f32[1,128], index: 2, kind: input, shape index: {}]   ;;  %s673_s3 = inlined_call_operand.hbm [shape: bf16[128,128], index: 3, kind: input, shape index: {}]   ;;  %s674_s4 = inlined_call_operand.vmem [shape: f32[1,128], index: 4, kind: input, shape index: {}]   ;;  %s675_s5 = inlined_call_operand.hbm [shape: bf16[128,128], index: 5, kind: input, shape index: {}]   ;;  %s676_s6 = inlined_call_operand.vmem [shape: f32[1,128], index: 6, kind: input, shape index: {}]   ;;  %s677_s7 = inlined_call_operand.vmem [shape: f32[16,128], index: 7, kind: output, shape index: {}]  }
   0x1   :  { %13 = vsyncpa [#allocation5], 0  ;;  %s549_s24 = smov [#allocation2]   ;;  %s501_s28 = scalar_lea.hbm %s673_s3, 1024 }
   0x2   :  { %s25_s25 = sshll.u32 %s549_s24, 4  ;;  %p502_p0 = scmp.ne.s32.totalorder %s673_s3, %s501_s28  ;;  %s26_s25 = int_to_ptr.vmem [resolvable:$true] %s25_s25 }
   0x3   :  { %p505_p1 = scmp.lt.u32.totalorder %s501_s28, %s673_s3 }
   0x5   :  { %p507_p2 = pnand %p505_p1, %p502_p0 }
   0x7   :  { %510 = shalt.err (!%p507_p2)
}
   0x8   :  { %s511_s10 = scalar_lea.vmem %s26_s25, 1024  ;;  %p516_p4 = scmp.lt.s32.totalorder %s26_s25, %s26_s25 }
   0x9   :  { %p512_p3 = scmp.ne.s32.totalorder %s26_s25, %s511_s10  ;;  %p517_p5 = scmp.lt.s32.totalorder %s511_s10, %s511_s10 }
   0xb   :  { %p518_p6 = por %p517_p5, %p516_p4 }
   0xd   :  { %p519_p7 = pnand %p518_p6, %p512_p3 }
   0xf   :  { %522 = shalt.err (!%p519_p7)
}
  0x10   :  { %s550_s11 = smov 64   ;;  %s551_s12 = smov 4  }
  0x11   :  { %31 = dma.hbm_to_vmem [thread:$0]  %s673_s3, 1024, %s26_s25, [#allocation3], %s550_s11, %s550_s11, %s551_s12  }
  0x12   :  { %s552_s15 = smov [#allocation4]   ;;  %s523_s19 = scalar_lea.hbm %s675_s5, 1024 }
  0x13   :  { %s39_s16 = sshll.u32 %s552_s15, 4  ;;  %p524_p8 = scmp.ne.s32.totalorder %s675_s5, %s523_s19  ;;  %s40_s16 = int_to_ptr.vmem [resolvable:$true] %s39_s16 }
  0x14   :  { %p527_p9 = scmp.lt.u32.totalorder %s523_s19, %s675_s5 }
  0x16   :  { %p529_p10 = pnand %p527_p9, %p524_p8 }
  0x18   :  { %532 = shalt.err (!%p529_p10)
}
  0x19   :  { %s533_s24 = scalar_lea.vmem %s40_s16, 1024  ;;  %p538_p12 = scmp.lt.s32.totalorder %s40_s16, %s40_s16 }
  0x1a   :  { %p534_p11 = scmp.ne.s32.totalorder %s40_s16, %s533_s24  ;;  %p539_p13 = scmp.lt.s32.totalorder %s533_s24, %s533_s24 }
  0x1c   :  { %p540_p0 = por %p539_p13, %p538_p12 }
  0x1e   :  { %p541_p1 = pnand %p540_p0, %p534_p11 }
  0x20   :  { %544 = shalt.err (!%p541_p1)
}
  0x21   :  { %45 = dma.hbm_to_vmem [thread:$0]  %s675_s5, 1024, %s40_s16, [#allocation5], %s550_s11, %s550_s11, %s551_s12  }
  0x22   :  { %545 = dma.done.wait [#allocation3], 1024  }
  0x23   :  { %546 = vsyncadd [#allocation3], 4294966272 }
  0x24   :  { %547 = dma.done.wait [#allocation5], 1024  }
  0x25   :  { %548 = vsyncadd [#allocation5], 4294966272  ;;  %v553_v0 = vmov 0.0   ;;  %vm554_vm0 = vmmov 0   ;;  %v475_v1 = vld [vmem:[%s671_s1] sm:$0xff]   ;;  %v476_v2 = vld [vmem:[%s671_s1 + $0x8] sm:$0xff]  }
  0x26   :  { %421 = vmatprep.subr.bf16.mxu0 %v553_v0  ;;  %425 = vmatprep.mubr.msk.bf16.mxu0 %vm554_vm0, %v553_v0  ;;  %v55_v3 = vld [vmem:[%s670_s0] sm:$0xff]  ;;  %v56_v4 = vld [vmem:[%s670_s0 + $0x8] sm:$0xff]  ;;  %vm81_vm1 = vcmask 261120   ;;  %v479_v8 = vld [vmem:[#allocation2 + $0x10] sm:$0xff]  }
  0x27   :  { %429 = vmatprep.subr.bf16.mxu1 %v553_v0  ;;  %445 = vmatprep.mubr.msk.bf16.mxu1 %vm554_vm0, %v553_v0  ;;  %v477_v5 = vld [vmem:[#allocation2] sm:$0xff]   ;;  %v57_v6 = vpack.c.bf16 %v56_v4, %v55_v3  ;;  %v478_v7 = vld [vmem:[#allocation2 + $0x8] sm:$0xff]   ;;  %v480_v9 = vld [vmem:[#allocation2 + $0x18] sm:$0xff]  }
  0x28   :  { %422 = vmatpush3.bf16.msra.mxu0 %v475_v1  ;;  %430 = vmatpush3.bf16.msra.mxu1 %v477_v5  ;;  %v481_v10 = vld [vmem:[#allocation2 + $0x20] sm:$0xff]   ;;  %v482_v11 = vld [vmem:[#allocation2 + $0x28] sm:$0xff]   ;;  %v483_v12 = vld [vmem:[#allocation2 + $0x30] sm:$0xff]  }
  0x29   :  { %423 = vmatprep.subr.bf16.mxu0 %v553_v0  ;;  %431 = vmatprep.subr.bf16.mxu1 %v553_v0  ;;  %v484_v13 = vld [vmem:[#allocation2 + $0x38] sm:$0xff]   ;;  %v485_v14 = vld [vmem:[#allocation4] sm:$0xff]   ;;  %v486_v15 = vld [vmem:[#allocation4 + $0x8] sm:$0xff]  }
  0x2a   :  { %v487_v16 = vld [vmem:[#allocation4 + $0x10] sm:$0xff]   ;;  %v488_v17 = vld [vmem:[#allocation4 + $0x18] sm:$0xff]   ;;  %v489_v18 = vld [vmem:[#allocation4 + $0x20] sm:$0xff]  }
  0x2b   :  { %v490_v19 = vld [vmem:[#allocation4 + $0x28] sm:$0xff]   ;;  %v376_v20 = vld [vmem:[%s672_s2] ss:$0 sm:$0xff]  ;;  %v491_v30 = vld [vmem:[#allocation4 + $0x30] sm:$0xff]  }
  0x2c   :  { %424 = vmatpush3.bf16.msra.mxu0 %v476_v2  ;;  %432 = vmatpush3.bf16.msra.mxu1 %v478_v7  ;;  %v492_v31 = vld [vmem:[#allocation4 + $0x38] sm:$0xff]   ;;  %v380_v32 = vld [vmem:[%s674_s4] ss:$0 sm:$0xff] }
  0x2d   :  { %449 = vmatprep.subr.bf16.mxu0 %v553_v0  ;;  %433 = vmatprep.subr.bf16.mxu1 %v553_v0  ;;  %v389_v42 = vld [vmem:[%s676_s6] ss:$0 sm:$0xff] }
  0x2f   :  { %426 = vmatmul.mubr.msk.bf16.vlgmr.msra.gmra.mrb[0].mxu0 %vm81_vm1, %v57_v6 }
  0x30   :  { %465 = vmatprep.mubr.msk.bf16.mxu0 %vm554_vm0, %v553_v0  ;;  %434 = vmatpush3.bf16.msra.mxu1 %v479_v8 }
  0x31   :  { %435 = vmatprep.subr.bf16.mxu1 %v553_v0  ;;  %450 = vmatpush3.bf16.msra.mxu0 %v485_v14 }
  0x32   :  { %451 = vmatprep.subr.bf16.mxu0 %v553_v0 }
  0x34   :  { %436 = vmatpush3.bf16.msra.mxu1 %v480_v9 }
  0x35   :  { %437 = vmatprep.subr.bf16.mxu1 %v553_v0  ;;  %452 = vmatpush3.bf16.msra.mxu0 %v486_v15 }
  0x36   :  { %453 = vmatprep.subr.bf16.mxu0 %v553_v0 }
  0x38   :  { %438 = vmatpush3.bf16.msra.mxu1 %v481_v10 }
  0x39   :  { %439 = vmatprep.subr.bf16.mxu1 %v553_v0  ;;  %454 = vmatpush3.bf16.msra.mxu0 %v487_v16 }
  0x3a   :  { %455 = vmatprep.subr.bf16.mxu0 %v553_v0 }
  0x3c   :  { %440 = vmatpush3.bf16.msra.mxu1 %v482_v11 }
  0x3d   :  { %441 = vmatprep.subr.bf16.mxu1 %v553_v0  ;;  %456 = vmatpush3.bf16.msra.mxu0 %v488_v17 }
  0x3e   :  { %457 = vmatprep.subr.bf16.mxu0 %v553_v0 }
  0x40   :  { %442 = vmatpush3.bf16.msra.mxu1 %v483_v12 }
  0x41   :  { %443 = vmatprep.subr.bf16.mxu1 %v553_v0  ;;  %458 = vmatpush3.bf16.msra.mxu0 %v489_v18 }
  0x42   :  { %459 = vmatprep.subr.bf16.mxu0 %v553_v0 }
  0x44   :  { %444 = vmatpush3.bf16.msra.mxu1 %v484_v13 }
  0x45   :  { %460 = vmatpush3.bf16.msra.mxu0 %v490_v19 }
  0x46   :  { %461 = vmatprep.subr.bf16.mxu0 %v553_v0 }
  0x49   :  { %462 = vmatpush3.bf16.msra.mxu0 %v491_v30 }
  0x4a   :  { %463 = vmatprep.subr.bf16.mxu0 %v553_v0 }
  0x4d   :  { %464 = vmatpush3.bf16.msra.mxu0 %v492_v31 }
 0x102   :  { %v119_v21 = vpop.f32.mrb[0].mxu0 }
 0x103   :  { %v120_v22 = vadd.f32 %v376_v20, %v119_v21  ;;  %v427_v23 = vpop.f32.mrb[1].mxu0 }
 0x104   :  { %v122_v24 = vpop.f32.mrb[2].mxu0 }
 0x105   :  { %v123_v25 = vadd.f32 %v376_v20, %v122_v24  ;;  %v428_v26 = vpop.f32.mrb[3].mxu0  ;;  %v126_v27 = vmax.f32 %v120_v22, 0.0 }
 0x107   :  { %v127_v28 = vmax.f32 %v123_v25, 0.0 }
 0x109   :  { %v128_v29 = vpack.c.bf16 %v127_v28, %v126_v27 }
 0x10b   :  { %446 = vmatmul.mubr.bf16.vlgmr.msra.gmra.mrb[0].mxu1 %v128_v29 }
 0x1de   :  { %v234_v33 = vpop.f32.mrb[0].mxu1 }
 0x1df   :  { %v235_v34 = vadd.f32 %v380_v32, %v234_v33  ;;  %v447_v35 = vpop.f32.mrb[1].mxu1 }
 0x1e0   :  { %v237_v36 = vpop.f32.mrb[2].mxu1 }
 0x1e1   :  { %v238_v37 = vadd.f32 %v380_v32, %v237_v36  ;;  %v448_v38 = vpop.f32.mrb[3].mxu1  ;;  %v241_v39 = vmax.f32 %v235_v34, 0.0 }
 0x1e3   :  { %v242_v40 = vmax.f32 %v238_v37, 0.0 }
 0x1e5   :  { %v243_v41 = vpack.c.bf16 %v242_v40, %v241_v39 }
 0x1e7   :  { %466 = vmatmul.mubr.bf16.vlgmr.msra.gmra.mrb[4].mxu0 %v243_v41 }
 0x2ba   :  { %v349_v43 = vpop.f32.mrb[4].mxu0 }
 0x2bb   :  { %v350_v44 = vadd.f32 %v389_v42, %v349_v43  ;;  %v467_v45 = vpop.f32.mrb[5].mxu0 }
 0x2bc   :  { %v352_v46 = vpop.f32.mrb[6].mxu0 }
 0x2bd   :  { %v398_v47 = vmul.f32 -1.442695, %v350_v44  ;;  %v353_v48 = vadd.f32 %v389_v42, %v352_v46  ;;  %v468_v49 = vpop.f32.mrb[7].mxu0 }
 0x2bf   :  { %493 = vpow2.f32 %v398_v47  ;;  %v399_v50 = vmul.f32 -1.442695, %v353_v48 }
 0x2c1   :  { %495 = vpow2.f32 %v399_v50 }
 0x2c9   :  { %v494_v51 = vpop.eup %493 }
 0x2ca   :  { %v362_v52 = vadd.f32 1.0, %v494_v51 }
 0x2cb   :  { %v496_v53 = vpop.eup %495 }
 0x2cc   :  { %497 = vrcp.f32 %v362_v52  ;;  %v363_v54 = vadd.f32 1.0, %v496_v53 }
 0x2ce   :  { %499 = vrcp.f32 %v363_v54 }
 0x2d6   :  { %v498_v55 = vpop.eup %497 }
 0x2d7   :  { %368 = vst [vmem:[%s677_s7] sm:$0xff] %v498_v55 }
 0x2d8   :  { %v500_v56 = vpop.eup %499 }
 0x2d9   :  { %369 = vst [vmem:[%s677_s7 + $0x8] sm:$0xff] %v500_v56 }
 0x2da   :  { %374 = vsyncpa [#allocation3], 1 }
 0x2db   :  { %375 = vsyncpa [#allocation5], 1 }

</bundles_post_ra>
